<compile_context>
chip_gen: v6e
topology: v6e:2x2x1
jax: 0.10.0
libtpu: 0.0.40
codegen_flags: <defaults>
</compile_context>

<pallas_src>
import functools
import math

import jax
import jax.numpy as jnp
from jax.experimental import pallas as pl
from jax.experimental.pallas import tpu as pltpu


def _bce_tversky_stats_kernel(pred_ref, tgt_ref, stats_ref, *, num_classes):
    """Accumulates per-(class, folded-W) partial statistics for one (n, h) tile.

    stats rows (class-major, 4 per class c):
      4c+0: intersection  = sum_h softmax_c * [target == c]
      4c+1: prob col-sum  = sum_h softmax_c
      4c+2: target count  = sum_h [target == c]
      4c+3: summed NLL    = sum_h (logsumexp - logit_c) * [target == c]
    """
    C = num_classes

    @pl.when(pl.program_id(1) == 0)
    def _init():
        stats_ref[...] = jnp.zeros_like(stats_ref)

    pred = pred_ref[...].astype(jnp.float32)      # (C, TH, Wf) logits (upcast in-kernel)
    tgt = tgt_ref[...]                            # (TH, Wf) int32 class ids

    # Softmax / logsumexp over the class axis (axis 0).
    m = jnp.max(pred, axis=0, keepdims=True)      # (1, TH, Wf)
    ex = jnp.exp(pred - m)                        # (C, TH, Wf)
    z = jnp.sum(ex, axis=0, keepdims=True)        # (1, TH, Wf)
    inv_z = 1.0 / z                               # exact: probas sum to 1
    lse = m[0] + jnp.log(z[0])                    # (TH, Wf) logsumexp per pixel

    # Static, unrolled class loop -> no (C, TH, Wf) one-hot temporary; mask applied
    # with a single float mask + multiplies (cheaper than two jnp.where selects).
    rows = []
    for c in range(C):
        maskf = (tgt == c).astype(jnp.float32)    # (TH, Wf) 0/1
        p_c = ex[c] * inv_z[0]                    # softmax prob of class c
        nll_c = lse - pred[c]                     # -log softmax_c per pixel (exact)
        rows.append(jnp.sum(p_c * maskf, axis=0, keepdims=True))    # intersection
        rows.append(jnp.sum(p_c, axis=0, keepdims=True))            # prob col-sum
        rows.append(jnp.sum(maskf, axis=0, keepdims=True))          # target count
        rows.append(jnp.sum(nll_c * maskf, axis=0, keepdims=True))  # summed NLL
    stacked = jnp.concatenate(rows, axis=0)       # (4*C, Wf), one concat per step
    stats_ref[...] += stacked[None, :, :]


def _vmem_capacity_bytes():
    try:
        return int(pltpu.get_tpu_info().vmem_capacity_bytes)
    except Exception:
        return 64 << 20                           # conservative (v7x-sized) default


def _choose_fold(H, W):
    """Fold factor k (dividing H) so the folded last dim k*W is lane-dense."""
    if W % 128 == 0:
        return 1
    need = 128 // math.gcd(W, 128)                # smallest k with (k*W) % 128 == 0
    if H % need == 0:
        return need
    best = 1
    for k in range(1, H + 1):                     # fallback: best fill of one vreg width
        if H % k == 0 and k * W <= 128:
            best = k
    return best


def _choose_tile_h(Hf, C, Wf_pad, budget_bytes):
    """Largest H tile that is a multiple of 8 AND divides Hf (so no padded rows leak
    into the accumulators) under the f32 pred-tile budget; full extent if it fits."""
    max_rows = max(1, budget_bytes // (C * Wf_pad * 4))
    if Hf <= max_rows:
        return Hf
    best = None
    t = 8
    while t <= min(Hf - 1, max_rows):
        if Hf % t == 0:
            best = t
        t += 8
    if best is not None:
        return best
    # TODO(synk): no multiple-of-8 divisor fits the budget (odd Hf); the full-extent
    # fallback can exceed the budget for pathological shapes.
    return Hf


def bce_tversky_loss(pred, target, *, num_classes, alpha, beta, phi, cel, ftl,
                     eps=1e-7):
    """pred: (N, C, H, W) float logits; target: (N, 1, H, W) or (N, H, W) int map."""
    if abs(float(cel) + float(ftl) - 1.0) > 1e-6:
        raise ValueError("Cross Entropy weight and Tversky weight should sum to 1")

    N, C, H, W = pred.shape
    assert C == num_classes

    tgt = jnp.reshape(target, (N, H, W))
    if tgt.dtype != jnp.int32:
        tgt = tgt.astype(jnp.int32)

    # Lane-density folding: (H, W) -> (H/k, k*W); contiguous reshape (pure view).
    k = _choose_fold(H, W)
    Hf, Wf = H // k, k * W
    pred_f = jnp.reshape(pred, (N, C, Hf, Wf))    # native dtype (f32 or bf16)
    tgt_f = jnp.reshape(tgt, (N, Hf, Wf))

    # Generation-aware pred-tile budget (v7x: 64 MiB VMEM; v5e/v6e: 128 MiB).
    vmem_cap = _vmem_capacity_bytes()
    if vmem_cap <= (64 << 20):
        pred_budget = int(2.5 * (1 << 20))        # keep temporaries well under 64 MiB
    else:
        pred_budget = 12 << 20                    # amortize per-step overhead on v5e/v6e

    wf_pad = -(-Wf // 128) * 128
    tile_h = _choose_tile_h(Hf, C, wf_pad, pred_budget)
    th_pad = -(-tile_h // 8) * 8

    # VMEM budget: double-buffered I/O tiles + ~5 f32 pred-tile-sized softmax/mask
    # temporaries + headroom, all counted with sublane/lane padding.
    itemsize = jnp.dtype(pred_f.dtype).itemsize
    pred_tile_in = C * th_pad * wf_pad * itemsize
    pred_tile_f32 = C * th_pad * wf_pad * 4
    tgt_tile = th_pad * wf_pad * 4
    out_tile = (-(-4 * C // 8) * 8) * wf_pad * 4
    need = 2 * (pred_tile_in + tgt_tile + out_tile) + 5 * pred_tile_f32 + (2 << 20)
    vmem_limit = int(min(max(need, 32 << 20), vmem_cap * 7 // 8))

    grid = (N, Hf // tile_h)
    kern = functools.partial(_bce_tversky_stats_kernel, num_classes=C)

    stats = pl.pallas_call(
        kern,
        out_shape=jax.ShapeDtypeStruct((N, 4 * C, Wf), jnp.float32),
        grid=grid,
        in_specs=[
            pl.BlockSpec((pl.Squeezed(), C, tile_h, Wf), lambda n, h: (n, 0, h, 0)),
            pl.BlockSpec((pl.Squeezed(), tile_h, Wf), lambda n, h: (n, h, 0)),
        ],
        # Per-n partial-stat blocks: constant across the H (reduction) axis, distinct
        # per n -> the N axis can be megacore-sharded on v7x.
        out_specs=pl.BlockSpec((1, 4 * C, Wf), lambda n, h: (n, 0, 0)),
        compiler_params=pltpu.CompilerParams(
            dimension_semantics=("parallel", "arbitrary"),
            vmem_limit_bytes=vmem_limit,
        ),
        cost_estimate=pl.CostEstimate(
            flops=int(12 * C * N * H * W),
            transcendentals=int((C + 2) * N * H * W),   # exp per class + log + recip
            bytes_accessed=int(N * C * H * W * itemsize + N * H * W * 4
                               + N * 4 * C * Wf * 4),
        ),
    )(pred_f, tgt_f)                              # (N, 4*C, Wf) f32 partial stats

    # Tiny finalize in plain JAX (negligible work; keeps the kernel core-parallel).
    s = jnp.sum(stats, axis=0)                    # (4*C, Wf): reduce over batch
    s = jnp.sum(jnp.reshape(s, (C, 4, k, W)), axis=2)   # un-fold lanes -> (C, 4, W)
    inter, psum, cnt, nll = s[:, 0], s[:, 1], s[:, 2], s[:, 3]

    # Focal-Tversky over per-(class, W) stats (PyTorch sums over dims (0, 2) of NCHW).
    fps = psum - inter                            # sum probas*(1-onehot)
    fns = cnt - inter                             # sum (1-probas)*onehot
    denom = inter + alpha * fps + beta * fns + eps
    tv = jnp.power(1.0 - jnp.mean(inter / denom), phi)

    # Weighted cross entropy (PyTorch weighted-mean semantics).
    cnt_c = jnp.sum(cnt, axis=-1)                 # (C,) pixels per class
    nll_c = jnp.sum(nll, axis=-1)                 # (C,) summed -log p[target]
    wcls = 1.0 - cnt_c / jnp.sum(cnt_c)           # w[c] = 1 - count_c / total
    ce = jnp.sum(wcls * nll_c) / jnp.sum(wcls * cnt_c)

    return cel * ce + ftl * tv


if __name__ == "__main__":
    # module "init": num_classes, alpha, beta, phi, cel, ftl (no learnable weights)
    num_classes = 4
    alpha, beta, phi = 0.3, 0.7, 1.5
    cel, ftl = 0.5, 0.5

    N, H, W = 2, 16, 16
    key = jax.random.PRNGKey(0)
    k_pred, k_tgt = jax.random.split(key)
    pred = jax.random.normal(k_pred, (N, num_classes, H, W), dtype=jnp.float32)
    target = jax.random.randint(k_tgt, (N, 1, H, W), 0, num_classes, dtype=jnp.int32)

    loss_fn = jax.jit(functools.partial(
        bce_tversky_loss,
        num_classes=num_classes, alpha=alpha, beta=beta,
        phi=phi, cel=cel, ftl=ftl))
    loss = loss_fn(pred, target)
    jax.block_until_ready(loss)
    print("KERNEL_OK")
</pallas_src>

<mosaic_0001>
module attributes {stable_mosaic.version = 11 : i64} {
  func.func @_bce_tversky_stats_kernel(%arg0: i32, %arg1: i32, %arg2: memref<1x4x2x128xf32, #tpu.memory_space<vmem>>, %arg3: memref<1x2x128xi32, #tpu.memory_space<vmem>>, %arg4: memref<1x16x128xf32, #tpu.memory_space<vmem>>) attributes {dimension_semantics = [#tpu.dimension_semantics<parallel>, #tpu.dimension_semantics<arbitrary>], iteration_bounds = array<i64: 2, 1>, scalar_prefetch = 0 : i64, scratch_operands = 0 : i64, tpu.core_type = #tpu.core_type<tc>, window_params = [{transform_indices = @transform_0, window_bounds = array<i64: 1, 4, 2, 128>}, {transform_indices = @transform_1, window_bounds = array<i64: 1, 2, 128>}, {transform_indices = @transform_2, window_bounds = array<i64: 1, 16, 128>}]} {
    %c0_i32 = arith.constant 0 : i32
    %0 = arith.cmpi eq, %arg1, %c0_i32 : i32
    %1 = arith.extui %0 : i1 to i32
    %c0_i32_0 = arith.constant 0 : i32
    %2 = arith.cmpi ne, %1, %c0_i32_0 : i32
    scf.if %2 {
      %cst_32 = arith.constant 0.000000e+00 : f32
      %109 = vector.broadcast %cst_32 : f32 to vector<1x16x128xf32>
      %c0_33 = arith.constant 0 : index
      %c0_34 = arith.constant 0 : index
      %c0_35 = arith.constant 0 : index
      %110 = vector.load %arg4[%c0_33, %c0_34, %c0_35] : memref<1x16x128xf32, #tpu.memory_space<vmem>>, vector<1x16x128xf32>
      tpu.vector_store %arg4[%c0_33, %c0_34, %c0_35], %109 {strides = array<i32>} : memref<1x16x128xf32, #tpu.memory_space<vmem>>, vector<1x16x128xf32>,
    } else {
    }
    %c0 = arith.constant 0 : index
    %c0_1 = arith.constant 0 : index
    %c0_2 = arith.constant 0 : index
    %c0_3 = arith.constant 0 : index
    %3 = vector.load %arg2[%c0, %c0_1, %c0_2, %c0_3] : memref<1x4x2x128xf32, #tpu.memory_space<vmem>>, vector<1x4x2x128xf32>
    %4 = vector.shape_cast %3 : vector<1x4x2x128xf32> to vector<4x2x128xf32>
    %c0_4 = arith.constant 0 : index
    %c0_5 = arith.constant 0 : index
    %c0_6 = arith.constant 0 : index
    %5 = vector.load %arg3[%c0_4, %c0_5, %c0_6] : memref<1x2x128xi32, #tpu.memory_space<vmem>>, vector<1x2x128xi32>
    %6 = vector.shape_cast %5 : vector<1x2x128xi32> to vector<2x128xi32>
    %cst = arith.constant dense<0xFF800000> : vector<2x128xf32>
    %7 = vector.multi_reduction <maximumf>, %4, %cst [0] : vector<4x2x128xf32> to vector<2x128xf32>
    %8 = vector.shape_cast %7 : vector<2x128xf32> to vector<1x2x128xf32>
    %9 = vector.broadcast %8 : vector<1x2x128xf32> to vector<4x2x128xf32>
    %10 = arith.subf %4, %9 : vector<4x2x128xf32>
    %11 = math.exp %10 : vector<4x2x128xf32>
    %cst_7 = arith.constant dense<0.000000e+00> : vector<2x128xf32>
    %12 = vector.multi_reduction <add>, %11, %cst_7 [0] : vector<4x2x128xf32> to vector<2x128xf32>
    %13 = vector.shape_cast %12 : vector<2x128xf32> to vector<1x2x128xf32>
    %cst_8 = arith.constant 1.000000e+00 : f32
    %14 = vector.broadcast %cst_8 : f32 to vector<1x2x128xf32>
    %15 = arith.divf %14, %13 : vector<1x2x128xf32>
    %16 = vector.shape_cast %8 : vector<1x2x128xf32> to vector<2x128xf32>
    %17 = vector.shape_cast %13 : vector<1x2x128xf32> to vector<2x128xf32>
    %18 = math.log %17 : vector<2x128xf32>
    %19 = arith.addf %16, %18 : vector<2x128xf32>
    %c0_i32_9 = arith.constant 0 : i32
    %20 = vector.broadcast %c0_i32_9 : i32 to vector<2x128xi32>
    %21 = arith.cmpi eq, %6, %20 : vector<2x128xi32>
    %22 = arith.extui %21 : vector<2x128xi1> to vector<2x128xi32>
    %23 = arith.sitofp %22 : vector<2x128xi32> to vector<2x128xf32>
    %24 = vector.extract_strided_slice %11 {offsets = [0, 0, 0], sizes = [1, 2, 128], strides = [1, 1, 1]} : vector<4x2x128xf32> to vector<1x2x128xf32>
    %25 = vector.shape_cast %24 : vector<1x2x128xf32> to vector<2x128xf32>
    %26 = vector.shape_cast %15 : vector<1x2x128xf32> to vector<2x128xf32>
    %27 = arith.mulf %25, %26 : vector<2x128xf32>
    %28 = vector.extract_strided_slice %4 {offsets = [0, 0, 0], sizes = [1, 2, 128], strides = [1, 1, 1]} : vector<4x2x128xf32> to vector<1x2x128xf32>
    %29 = vector.shape_cast %28 : vector<1x2x128xf32> to vector<2x128xf32>
    %30 = arith.subf %19, %29 : vector<2x128xf32>
    %31 = arith.mulf %27, %23 : vector<2x128xf32>
    %cst_10 = arith.constant dense<0.000000e+00> : vector<128xf32>
    %32 = vector.multi_reduction <add>, %31, %cst_10 [0] : vector<2x128xf32> to vector<128xf32>
    %33 = vector.shape_cast %32 : vector<128xf32> to vector<1x128xf32>
    %cst_11 = arith.constant dense<0.000000e+00> : vector<128xf32>
    %34 = vector.multi_reduction <add>, %27, %cst_11 [0] : vector<2x128xf32> to vector<128xf32>
    %35 = vector.shape_cast %34 : vector<128xf32> to vector<1x128xf32>
    %cst_12 = arith.constant dense<0.000000e+00> : vector<128xf32>
    %36 = vector.multi_reduction <add>, %23, %cst_12 [0] : vector<2x128xf32> to vector<128xf32>
    %37 = vector.shape_cast %36 : vector<128xf32> to vector<1x128xf32>
    %38 = arith.mulf %30, %23 : vector<2x128xf32>
    %cst_13 = arith.constant dense<0.000000e+00> : vector<128xf32>
    %39 = vector.multi_reduction <add>, %38, %cst_13 [0] : vector<2x128xf32> to vector<128xf32>
    %40 = vector.shape_cast %39 : vector<128xf32> to vector<1x128xf32>
    %c1_i32 = arith.constant 1 : i32
    %41 = vector.broadcast %c1_i32 : i32 to vector<2x128xi32>
    %42 = arith.cmpi eq, %6, %41 : vector<2x128xi32>
    %43 = arith.extui %42 : vector<2x128xi1> to vector<2x128xi32>
    %44 = arith.sitofp %43 : vector<2x128xi32> to vector<2x128xf32>
    %45 = vector.extract_strided_slice %11 {offsets = [1, 0, 0], sizes = [1, 2, 128], strides = [1, 1, 1]} : vector<4x2x128xf32> to vector<1x2x128xf32>
    %46 = vector.shape_cast %45 : vector<1x2x128xf32> to vector<2x128xf32>
    %47 = vector.shape_cast %15 : vector<1x2x128xf32> to vector<2x128xf32>
    %48 = arith.mulf %46, %47 : vector<2x128xf32>
    %49 = vector.extract_strided_slice %4 {offsets = [1, 0, 0], sizes = [1, 2, 128], strides = [1, 1, 1]} : vector<4x2x128xf32> to vector<1x2x128xf32>
    %50 = vector.shape_cast %49 : vector<1x2x128xf32> to vector<2x128xf32>
    %51 = arith.subf %19, %50 : vector<2x128xf32>
    %52 = arith.mulf %48, %44 : vector<2x128xf32>
    %cst_14 = arith.constant dense<0.000000e+00> : vector<128xf32>
    %53 = vector.multi_reduction <add>, %52, %cst_14 [0] : vector<2x128xf32> to vector<128xf32>
    %54 = vector.shape_cast %53 : vector<128xf32> to vector<1x128xf32>
    %cst_15 = arith.constant dense<0.000000e+00> : vector<128xf32>
    %55 = vector.multi_reduction <add>, %48, %cst_15 [0] : vector<2x128xf32> to vector<128xf32>
    %56 = vector.shape_cast %55 : vector<128xf32> to vector<1x128xf32>
    %cst_16 = arith.constant dense<0.000000e+00> : vector<128xf32>
    %57 = vector.multi_reduction <add>, %44, %cst_16 [0] : vector<2x128xf32> to vector<128xf32>
    %58 = vector.shape_cast %57 : vector<128xf32> to vector<1x128xf32>
    %59 = arith.mulf %51, %44 : vector<2x128xf32>
    %cst_17 = arith.constant dense<0.000000e+00> : vector<128xf32>
    %60 = vector.multi_reduction <add>, %59, %cst_17 [0] : vector<2x128xf32> to vector<128xf32>
    %61 = vector.shape_cast %60 : vector<128xf32> to vector<1x128xf32>
    %c2_i32 = arith.constant 2 : i32
    %62 = vector.broadcast %c2_i32 : i32 to vector<2x128xi32>
    %63 = arith.cmpi eq, %6, %62 : vector<2x128xi32>
    %64 = arith.extui %63 : vector<2x128xi1> to vector<2x128xi32>
    %65 = arith.sitofp %64 : vector<2x128xi32> to vector<2x128xf32>
    %66 = vector.extract_strided_slice %11 {offsets = [2, 0, 0], sizes = [1, 2, 128], strides = [1, 1, 1]} : vector<4x2x128xf32> to vector<1x2x128xf32>
    %67 = vector.shape_cast %66 : vector<1x2x128xf32> to vector<2x128xf32>
    %68 = vector.shape_cast %15 : vector<1x2x128xf32> to vector<2x128xf32>
    %69 = arith.mulf %67, %68 : vector<2x128xf32>
    %70 = vector.extract_strided_slice %4 {offsets = [2, 0, 0], sizes = [1, 2, 128], strides = [1, 1, 1]} : vector<4x2x128xf32> to vector<1x2x128xf32>
    %71 = vector.shape_cast %70 : vector<1x2x128xf32> to vector<2x128xf32>
    %72 = arith.subf %19, %71 : vector<2x128xf32>
    %73 = arith.mulf %69, %65 : vector<2x128xf32>
    %cst_18 = arith.constant dense<0.000000e+00> : vector<128xf32>
    %74 = vector.multi_reduction <add>, %73, %cst_18 [0] : vector<2x128xf32> to vector<128xf32>
    %75 = vector.shape_cast %74 : vector<128xf32> to vector<1x128xf32>
    %cst_19 = arith.constant dense<0.000000e+00> : vector<128xf32>
    %76 = vector.multi_reduction <add>, %69, %cst_19 [0] : vector<2x128xf32> to vector<128xf32>
    %77 = vector.shape_cast %76 : vector<128xf32> to vector<1x128xf32>
    %cst_20 = arith.constant dense<0.000000e+00> : vector<128xf32>
    %78 = vector.multi_reduction <add>, %65, %cst_20 [0] : vector<2x128xf32> to vector<128xf32>
    %79 = vector.shape_cast %78 : vector<128xf32> to vector<1x128xf32>
    %80 = arith.mulf %72, %65 : vector<2x128xf32>
    %cst_21 = arith.constant dense<0.000000e+00> : vector<128xf32>
    %81 = vector.multi_reduction <add>, %80, %cst_21 [0] : vector<2x128xf32> to vector<128xf32>
    %82 = vector.shape_cast %81 : vector<128xf32> to vector<1x128xf32>
    %c3_i32 = arith.constant 3 : i32
    %83 = vector.broadcast %c3_i32 : i32 to vector<2x128xi32>
    %84 = arith.cmpi eq, %6, %83 : vector<2x128xi32>
    %85 = arith.extui %84 : vector<2x128xi1> to vector<2x128xi32>
    %86 = arith.sitofp %85 : vector<2x128xi32> to vector<2x128xf32>
    %87 = vector.extract_strided_slice %11 {offsets = [3, 0, 0], sizes = [1, 2, 128], strides = [1, 1, 1]} : vector<4x2x128xf32> to vector<1x2x128xf32>
    %88 = vector.shape_cast %87 : vector<1x2x128xf32> to vector<2x128xf32>
    %89 = vector.shape_cast %15 : vector<1x2x128xf32> to vector<2x128xf32>
    %90 = arith.mulf %88, %89 : vector<2x128xf32>
    %91 = vector.extract_strided_slice %4 {offsets = [3, 0, 0], sizes = [1, 2, 128], strides = [1, 1, 1]} : vector<4x2x128xf32> to vector<1x2x128xf32>
    %92 = vector.shape_cast %91 : vector<1x2x128xf32> to vector<2x128xf32>
    %93 = arith.subf %19, %92 : vector<2x128xf32>
    %94 = arith.mulf %90, %86 : vector<2x128xf32>
    %cst_22 = arith.constant dense<0.000000e+00> : vector<128xf32>
    %95 = vector.multi_reduction <add>, %94, %cst_22 [0] : vector<2x128xf32> to vector<128xf32>
    %96 = vector.shape_cast %95 : vector<128xf32> to vector<1x128xf32>
    %cst_23 = arith.constant dense<0.000000e+00> : vector<128xf32>
    %97 = vector.multi_reduction <add>, %90, %cst_23 [0] : vector<2x128xf32> to vector<128xf32>
    %98 = vector.shape_cast %97 : vector<128xf32> to vector<1x128xf32>
    %cst_24 = arith.constant dense<0.000000e+00> : vector<128xf32>
    %99 = vector.multi_reduction <add>, %86, %cst_24 [0] : vector<2x128xf32> to vector<128xf32>
    %100 = vector.shape_cast %99 : vector<128xf32> to vector<1x128xf32>
    %101 = arith.mulf %93, %86 : vector<2x128xf32>
    %cst_25 = arith.constant dense<0.000000e+00> : vector<128xf32>
    %102 = vector.multi_reduction <add>, %101, %cst_25 [0] : vector<2x128xf32> to vector<128xf32>
    %103 = vector.shape_cast %102 : vector<128xf32> to vector<1x128xf32>
    %104 = tpu.concatenate %33, %35, %37, %40, %54, %56, %58, %61, %75, %77, %79, %82, %96, %98, %100, %103 in 0 : vector<1x128xf32>, vector<1x128xf32>, vector<1x128xf32>, vector<1x128xf32>, vector<1x128xf32>, vector<1x128xf32>, vector<1x128xf32>, vector<1x128xf32>, vector<1x128xf32>, vector<1x128xf32>, vector<1x128xf32>, vector<1x128xf32>, vector<1x128xf32>, vector<1x128xf32>, vector<1x128xf32>, vector<1x128xf32> -> vector<16x128xf32>
    %c0_26 = arith.constant 0 : index
    %c0_27 = arith.constant 0 : index
    %c0_28 = arith.constant 0 : index
    %105 = vector.load %arg4[%c0_26, %c0_27, %c0_28] : memref<1x16x128xf32, #tpu.memory_space<vmem>>, vector<1x16x128xf32>
    %106 = vector.shape_cast %104 : vector<16x128xf32> to vector<1x16x128xf32>
    %107 = arith.addf %105, %106 : vector<1x16x128xf32>
    %c0_29 = arith.constant 0 : index
    %c0_30 = arith.constant 0 : index
    %c0_31 = arith.constant 0 : index
    %108 = vector.load %arg4[%c0_29, %c0_30, %c0_31] : memref<1x16x128xf32, #tpu.memory_space<vmem>>, vector<1x16x128xf32>
    tpu.vector_store %arg4[%c0_29, %c0_30, %c0_31], %107 {strides = array<i32>} : memref<1x16x128xf32, #tpu.memory_space<vmem>>, vector<1x16x128xf32>,
    return
  }
  func.func @transform_0(%arg0: i32, %arg1: i32) -> (i32, i32, i32, i32) {
    %c0_i32 = arith.constant 0 : i32
    %c0_i32_0 = arith.constant 0 : i32
    %c0_i32_1 = arith.constant 0 : i32
    return %arg0, %c0_i32, %arg1, %c0_i32_0 : i32, i32, i32, i32
  }
  func.func @transform_1(%arg0: i32, %arg1: i32) -> (i32, i32, i32) {
    %c0_i32 = arith.constant 0 : i32
    %c0_i32_0 = arith.constant 0 : i32
    return %arg0, %arg1, %c0_i32 : i32, i32, i32
  }
  func.func @transform_2(%arg0: i32, %arg1: i32) -> (i32, i32, i32) {
    %c0_i32 = arith.constant 0 : i32
    %c0_i32_0 = arith.constant 0 : i32
    %c0_i32_1 = arith.constant 0 : i32
    return %arg0, %c0_i32, %c0_i32_0 : i32, i32, i32
  }
}

</mosaic_0001>

<bundles_post_ra>
// kernel: bce_tversky_loss.1
= control target key start
LH: loop header
LB: loop body
LE: loop exit
PB: predicated region body
PF: predicated region fallthrough
CT: control target
= control target key end

     0   :  { %s583_s9 = smov 0   ;;  %s585_s10 = smov 0   ;;  %s736_s0 = inlined_call_operand.vmem [shape: f32[2,4,2,128], index: 0, kind: input, shape index: {}]   ;;  %s737_s1 = inlined_call_operand.vmem [shape: s32[2,2,128], index: 1, kind: input, shape index: {}]   ;;  %s738_s2 = inlined_call_operand.vmem [shape: f32[2,16,128], index: 2, kind: output, shape index: {}]  }
   0x1   :  { %s587_s11 = smov 0  }
   0x2 LB: > { %s24_s12 = sadd.s32 1, %s561_s10  ;;  %p492_p0 = scmp.ge.s32.totalorder %s565_s11, 1  ;;  %s565_s11 = sphi %s587_s11, %s12_s11   ;;  %s561_s10 = sphi %s585_s10, %s740_s10   ;;  %s557_s9 = sphi %s583_s9, %s739_s9  }
   0x3   : > { %p26_p1 = scmp.ge.s32.totalorder %s24_s12, 2  ;;  %p143_p2 = scmp.lt.s32.totalorder %s565_s11, 3 }
   0x5   : > { %s742_s12 = smov (%p26_p1, %s24_s12), 0  ;;  %p144_p3 = pnand %p492_p0, %p143_p2 }
   0x6   : > { %p175_p4 = scmp.lt.s32.totalorder (!%p144_p3), %s557_s9, 1 }
   0x7   : > { %147 = sbr.rel (%p144_p3) target bundleno = 100 (0x64), region = 28 }
   0xc   : > { %s744_s9 = smov (!%p175_p4, %s557_s9), 1  ;;  %vm206_vm0 = vcmask 1041408   ;;  %v567_v21 = vmov 0.0   ;;  %vm378_vm5 = vcmask 1040384   ;;  %vm381_vm6 = vcmask 1042432  }
   0xd   : > { %s504_s13 = sshll.u32 %s744_s9, 3  ;;  %s495_s17 = sshll.u32 %s744_s9, 1  ;;  %vm383_vm7 = vcmask 1043456   ;;  %vm385_vm8 = vcmask 1044480   ;;  %vm387_vm9 = vcmask 1045504   ;;  %vm389_vm10 = vcmask 1046528  }
   0xe   : > { %s182_s16 = scalar_lea.vmem %s736_s0, %s504_s13  ;;  %s189_s20 = scalar_lea.vmem %s737_s1, %s495_s17 }
   0xf   : > { %v607_v0 = vld [vmem:[%s182_s16] sm:$0x3]  ;;  %v609_v1 = vld [vmem:[%s182_s16 + $0x2] sm:$0x3]  ;;  %v611_v2 = vld [vmem:[%s182_s16 + $0x4] sm:$0x3] }
  0x10   : > { %v613_v3 = vld [vmem:[%s182_s16 + $0x6] sm:$0x3]  ;;  %v207_v4 = vsel %vm206_vm0, %v607_v0, -inf  ;;  %v208_v5 = vsel %vm206_vm0, %v609_v1, -inf  ;;  %v209_v6 = vsel %vm206_vm0, %v611_v2, -inf  ;;  %s505_s21 = sshll.u32 %s744_s9, 4 }
  0x11   : > { %v210_v7 = vsel %vm206_vm0, %v613_v3, -inf  ;;  %v211_v8 = vmax.f32 %v207_v4, %v208_v5  ;;  %v205_v19 = vld [vmem:[%s189_s20] sm:$0x3]  ;;  %s194_s24 = scalar_lea.vmem %s738_s2, %s505_s21 }
  0x12   : > { %v212_v9 = vmax.f32 %v209_v6, %v210_v7  ;;  %vm238_vm1 = vcmp.eq.s32.totalorder %v205_v19, 0  ;;  %vm273_vm2 = vcmp.eq.s32.totalorder %v205_v19, 1  ;;  %vm308_vm3 = vcmp.eq.s32.totalorder %v205_v19, 2 }
  0x13   : > { %v637_v22 = vsel %vm238_vm1, 1.0, %v567_v21  ;;  %vm343_vm4 = vcmp.eq.s32.totalorder %v205_v19, 3  ;;  %v645_v33 = vsel %vm273_vm2, 1.0, %v567_v21  ;;  %v500_v34 = vsel %vm308_vm3, 1.0, %v567_v21 }
  0x14   : > { %v623_v10 = vmax.f32 %v211_v8, %v212_v9  ;;  %v258_v25 = vsel %vm206_vm0, %v637_v22, 0.0  ;;  %v328_v36 = vsel %vm206_vm0, %v500_v34, 0.0  ;;  %v293_v37 = vsel %vm206_vm0, %v645_v33, 0.0 }
  0x15   : > { %v259_v32 = vrot.slane %v258_v25, 4  ;;  %v650_v38 = vsel %vm343_vm4, 1.0, %v567_v21  ;;  %v329_v42 = vrot.slane %v328_v36, 4  ;;  %v294_v43 = vrot.slane %v293_v37, 4 }
  0x16   : > { %v214_v11 = vsub.f32 %v607_v0, %v623_v10  ;;  %v215_v12 = vsub.f32 %v609_v1, %v623_v10  ;;  %v216_v13 = vsub.f32 %v611_v2, %v623_v10  ;;  %v217_v14 = vsub.f32 %v613_v3, %v623_v10 }
  0x17   : > { %v363_v40 = vsel %vm206_vm0, %v650_v38, 0.0  ;;  %v260_v41 = vadd.f32 %v259_v32, %v258_v25  ;;  %v330_v46 = vadd.f32 %v329_v42, %v328_v36  ;;  %v295_v47 = vadd.f32 %v294_v43, %v293_v37 }
  0x18   : > { %v218_v15 = vmul.f32 1.442695, %v214_v11  ;;  %v220_v16 = vmul.f32 1.442695, %v215_v12  ;;  %v222_v17 = vmul.f32 1.442695, %v216_v13 }
  0x19   : > { %v224_v18 = vmul.f32 1.442695, %v217_v14  ;;  %v364_v44 = vrot.slane %v363_v40, 4  ;;  %v261_v45 = vrot.slane %v260_v41, 2  ;;  %v331_v50 = vrot.slane %v330_v46, 2 }
  0x1a   : > { %531 = vpow2.f32 %v218_v15  ;;  %v296_v51 = vrot.slane %v295_v47, 2 }
  0x1b   : > { %533 = vpow2.f32 %v220_v16  ;;  %v365_v48 = vadd.f32 %v364_v44, %v363_v40  ;;  %v262_v49 = vadd.f32 %v261_v45, %v260_v41  ;;  %v654_v53 = vadd.f32 %v331_v50, %v330_v46 }
  0x1c   : > { %535 = vpow2.f32 %v222_v17  ;;  %v656_v55 = vadd.f32 %v296_v51, %v295_v47 }
  0x1d   : > { %537 = vpow2.f32 %v224_v18  ;;  %v366_v52 = vrot.slane %v365_v48, 2  ;;  %v263_v54 = vrot.slane %v262_v49, 1  ;;  %v333_v6 = vrot.slane %v654_v53, 1 }
  0x1e   : > { %v298_v5 = vrot.slane %v656_v55, 1 }
  0x1f   : > { %v658_v57 = vadd.f32 %v366_v52, %v365_v48  ;;  %v662_v4 = vadd.f32 %v263_v54, %v262_v49 }
  0x27   : > { %v532_v20 = vpop.eup %531 }
  0x28   : > { %v534_v23 = vpop.eup %533  ;;  %v226_v24 = vsel %vm206_vm0, %v532_v20, 0.0 }
  0x29   : > { %v536_v26 = vpop.eup %535  ;;  %v227_v27 = vsel %vm206_vm0, %v534_v23, 0.0 }
  0x2a   : > { %v538_v28 = vpop.eup %537  ;;  %v228_v29 = vadd.f32 %v227_v27, %v226_v24  ;;  %v229_v30 = vsel %vm206_vm0, %v536_v26, 0.0 }
  0x2b   : > { %v231_v31 = vsel %vm206_vm0, %v538_v28, 0.0 }
  0x2c   : > { %v230_v35 = vadd.f32 %v229_v30, %v228_v29 }
  0x2e   : > { %v232_v39 = vadd.f32 %v231_v31, %v230_v35 }
  0x30   : > { %539 = vrcp.f32 %v232_v39 }
  0x31   : > { %541 = vlog2.f32 %v232_v39 }
  0x3d   : > { %v540_v56 = vpop.eup %539 }
  0x3e   : > { %v542_v58 = vpop.eup %541  ;;  %v241_v59 = vmul.f32 %v540_v56, %v532_v20  ;;  %v276_v60 = vmul.f32 %v540_v56, %v534_v23  ;;  %v311_v61 = vmul.f32 %v540_v56, %v536_v26  ;;  %v660_v62 = vmul.f32 %v540_v56, %v538_v28 }
  0x3f   : > { %v236_v63 = vmul.f32 0.6931472, %v542_v58 }
  0x40   : > { %v243_v7 = vmul.f32 %v637_v22, %v241_v59  ;;  %v251_v8 = vsel %vm206_vm0, %v241_v59, 0.0  ;;  %v278_v9 = vmul.f32 %v645_v33, %v276_v60  ;;  %v313_v11 = vmul.f32 %v500_v34, %v311_v61 }
  0x41   : > { %v670_v12 = vadd.f32 %v236_v63, %v623_v10  ;;  %v252_v13 = vrot.slane %v251_v8, 4  ;;  %v321_v14 = vsel %vm206_vm0, %v311_v61, 0.0  ;;  %v675_v15 = vmul.f32 %v650_v38, %v660_v62 }
  0x42   : > { %v244_v16 = vsel %vm206_vm0, %v243_v7, 0.0  ;;  %v314_v17 = vsel %vm206_vm0, %v313_v11, 0.0  ;;  %v322_v18 = vrot.slane %v321_v14, 4  ;;  %v279_v19 = vsel %vm206_vm0, %v278_v9, 0.0 }
  0x43   : > { %v242_v20 = vsub.f32 %v670_v12, %v607_v0  ;;  %v245_v21 = vrot.slane %v244_v16, 4  ;;  %v253_v10 = vadd.f32 %v252_v13, %v251_v8  ;;  %v312_v23 = vsub.f32 %v670_v12, %v611_v2 }
  0x44   : > { %v315_v24 = vrot.slane %v314_v17, 4  ;;  %v323_v25 = vadd.f32 %v322_v18, %v321_v14  ;;  %v277_v26 = vsub.f32 %v670_v12, %v609_v1  ;;  %v280_v27 = vrot.slane %v279_v19, 4 }
  0x45   : > { %v246_v28 = vadd.f32 %v245_v21, %v244_v16  ;;  %v254_v29 = vrot.slane %v253_v10, 2  ;;  %v265_v30 = vmul.f32 %v637_v22, %v242_v20  ;;  %v335_v31 = vmul.f32 %v500_v34, %v312_v23 }
  0x46   : > { %v316_v32 = vadd.f32 %v315_v24, %v314_v17  ;;  %v324_v35 = vrot.slane %v323_v25, 2  ;;  %v281_v0 = vadd.f32 %v280_v27, %v279_v19  ;;  %v286_v36 = vsel %vm206_vm0, %v276_v60, 0.0 }
  0x47   : > { %v247_v37 = vrot.slane %v246_v28, 2  ;;  %v266_v2 = vsel %vm206_vm0, %v265_v30, 0.0  ;;  %v336_v39 = vsel %vm206_vm0, %v335_v31, 0.0  ;;  %v255_v40 = vadd.f32 %v254_v29, %v253_v10 }
  0x48   : > { %v267_v41 = vrot.slane %v266_v2, 4  ;;  %v317_v1 = vrot.slane %v316_v32, 2  ;;  %v337_v42 = vrot.slane %v336_v39, 4  ;;  %v282_v43 = vrot.slane %v281_v0, 2 }
  0x49   : > { %v248_v44 = vadd.f32 %v247_v37, %v246_v28  ;;  %v256_v45 = vrot.slane %v255_v40, 1  ;;  %v287_v46 = vrot.slane %v286_v36, 4  ;;  %v300_v22 = vmul.f32 %v645_v33, %v277_v26 }
  0x4a   : > { %v268_v34 = vadd.f32 %v267_v41, %v266_v2  ;;  %v318_v47 = vadd.f32 %v317_v1, %v316_v32  ;;  %v338_v48 = vadd.f32 %v337_v42, %v336_v39  ;;  %v283_v49 = vadd.f32 %v282_v43, %v281_v0 }
  0x4b   : > { %v249_v50 = vrot.slane %v248_v44, 1  ;;  %v257_v51 = vadd.f32 %v256_v45, %v255_v40  ;;  %v288_v52 = vadd.f32 %v287_v46, %v286_v36  ;;  %v301_v54 = vsel %vm206_vm0, %v300_v22, 0.0 }
  0x4c   : > { %v269_v56 = vrot.slane %v268_v34, 2  ;;  %v284_v58 = vrot.slane %v283_v49, 1  ;;  %v302_v59 = vrot.slane %v301_v54, 4  ;;  %v319_v60 = vrot.slane %v318_v47, 1 }
  0x4d   : > { %v250_v61 = vadd.f32 %v249_v50, %v248_v44  ;;  %v289_v63 = vrot.slane %v288_v52, 2  ;;  %v325_v33 = vadd.f32 %v324_v35, %v323_v25  ;;  %v339_v7 = vrot.slane %v338_v48, 2 }
  0x4e   : > { %v270_v8 = vadd.f32 %v269_v56, %v268_v34  ;;  %v285_v9 = vadd.f32 %v284_v58, %v283_v49  ;;  %v299_v11 = vadd.f32 %v298_v5, %v656_v55  ;;  %v303_v13 = vadd.f32 %v302_v59, %v301_v54 }
  0x4f   : > { %v290_v14 = vadd.f32 %v289_v63, %v288_v52  ;;  %v379_v16 = vsel %vm378_vm5, %v250_v61, %v257_v51  ;;  %v326_v17 = vrot.slane %v325_v33, 1  ;;  %v340_v18 = vadd.f32 %v339_v7, %v338_v48 }
  0x50   : > { %v271_v19 = vrot.slane %v270_v8, 1  ;;  %v304_v20 = vrot.slane %v303_v13, 2  ;;  %v320_v21 = vadd.f32 %v319_v60, %v318_v47  ;;  %v347_v10 = vsub.f32 %v670_v12, %v613_v3 }
  0x51   : > { %v291_v23 = vrot.slane %v290_v14, 1  ;;  %v380_v24 = vsel %vm206_vm0, %v379_v16, %v662_v4  ;;  %v327_v25 = vadd.f32 %v326_v17, %v325_v33  ;;  %v349_v55 = vsel %vm206_vm0, %v675_v15, 0.0 }
  0x52   : > { %v272_v5 = vadd.f32 %v271_v19, %v270_v8  ;;  %v305_v26 = vadd.f32 %v304_v20, %v303_v13  ;;  %v350_v27 = vrot.slane %v349_v55, 4  ;;  %v356_v28 = vsel %vm206_vm0, %v660_v62, 0.0 }
  0x53   : > { %v292_v29 = vadd.f32 %v291_v23, %v290_v14  ;;  %v341_v30 = vrot.slane %v340_v18, 1  ;;  %v357_v31 = vrot.slane %v356_v28, 4  ;;  %v370_v3 = vmul.f32 %v650_v38, %v347_v10 }
  0x54   : > { %v306_v12 = vrot.slane %v305_v26, 1  ;;  %v382_v32 = vsel %vm381_vm6, %v380_v24, %v272_v5  ;;  %v334_v4 = vadd.f32 %v333_v6, %v654_v53  ;;  %v351_v35 = vadd.f32 %v350_v27, %v349_v55 }
  0x55   : > { %v384_v15 = vsel %vm383_vm7, %v382_v32, %v285_v9  ;;  %v358_v0 = vadd.f32 %v357_v31, %v356_v28  ;;  %v371_v36 = vsel %vm206_vm0, %v370_v3, 0.0  ;;  %v391_v62 = vsel %vm378_vm5, %v320_v21, %v327_v25 }
  0x56   : > { %v307_v37 = vadd.f32 %v306_v12, %v305_v26  ;;  %v386_v2 = vsel %vm385_vm8, %v384_v15, %v292_v29  ;;  %v352_v38 = vrot.slane %v351_v35, 2  ;;  %v372_v39 = vrot.slane %v371_v36, 4 }
  0x57   : > { %v388_v40 = vsel %vm387_vm9, %v386_v2, %v299_v11  ;;  %v342_v41 = vadd.f32 %v341_v30, %v340_v18  ;;  %v359_v1 = vrot.slane %v358_v0, 2  ;;  %v368_v53 = vrot.slane %v658_v57, 1 }
  0x58   : > { %v390_v6 = vsel %vm389_vm10, %v388_v40, %v307_v37  ;;  %v353_v42 = vadd.f32 %v352_v38, %v351_v35  ;;  %v373_v43 = vadd.f32 %v372_v39, %v371_v36  ;;  %v392_v44 = vsel %vm206_vm0, %v391_v62, %v334_v4 }
  0x59   : > { %v360_v45 = vadd.f32 %v359_v1, %v358_v0  ;;  %402 = vst [vmem:[%s194_s24] sm:$0xff] %v390_v6  ;;  %v393_v47 = vsel %vm381_vm6, %v392_v44, %v342_v41  ;;  %v369_v49 = vadd.f32 %v368_v53, %v658_v57 }
  0x5a   : > { %v354_v46 = vrot.slane %v353_v42, 1  ;;  %v374_v22 = vrot.slane %v373_v43, 2 }
  0x5b   : > { %v361_v34 = vrot.slane %v360_v45, 1 }
  0x5c   : > { %v355_v48 = vadd.f32 %v354_v46, %v353_v42  ;;  %v375_v50 = vadd.f32 %v374_v22, %v373_v43 }
  0x5d   : > { %v362_v51 = vadd.f32 %v361_v34, %v360_v45 }
  0x5e   : > { %v376_v52 = vrot.slane %v375_v50, 1  ;;  %v394_v54 = vsel %vm383_vm7, %v393_v47, %v355_v48 }
  0x5f   : > { %v395_v56 = vsel %vm385_vm8, %v394_v54, %v362_v51 }
  0x60   : > { %v377_v58 = vadd.f32 %v376_v52, %v375_v50  ;;  %v396_v59 = vsel %vm387_vm9, %v395_v56, %v369_v49 }
  0x62   : > { %v397_v60 = vsel %vm389_vm10, %v396_v59, %v377_v58 }
  0x63   : > { %403 = vst [vmem:[%s194_s24 + $0x8] sm:$0xff] %v397_v60 }
  0x64 PF: > { %s12_s11 = sadd.s32 1, %s565_s11   ;;  %s739_s9 = smov %s561_s10 }
  0x65   : > { %p9_p5 = scmp.ge.s32.totalorder %s12_s11, 4   ;;  %s740_s10 = smov %s742_s12 }
  0x67   :  { %11 = sbr.rel (!%p9_p5) target bundleno = 2 (0x2), region = 65 }

</bundles_post_ra>
